<compile_context>
chip_gen: v7x
topology: tpu7x:2x2x1
jax: 0.10.0
libtpu: 0.0.40
codegen_flags: <defaults>
</compile_context>

<pallas_src>
import functools
import math

import jax
import jax.numpy as jnp
from jax.experimental import pallas as pl
from jax.experimental.pallas import tpu as pltpu


def _round_up(x, m):
    return (x + m - 1) // m * m


def _pick_q_tile(s):
    for t in (512, 256, 128, 64, 32, 16, 8):
        if s % t == 0:
            return t
    return s


_VMEM_LIMIT = 48 * 1024 * 1024  # fits v7x (64 MiB/TC) as well as v5e/v6e (128 MiB)


# ----------------------------------------------------------------------------
# Kernel 1: KV compression — one fat M-tiled matmul, shared weight resident.
# ----------------------------------------------------------------------------
def _compress_kernel(blk_ref, w_ref, b_ref, out_ref):
    # blk_ref: (TM, L*D) bf16   w_ref: (L*D, Dout) bf16   b_ref: (1, Dout) f32
    out_ref[...] = (
        jnp.dot(blk_ref[...], w_ref[...], preferred_element_type=jnp.float32)
        + b_ref[...]
    ).astype(out_ref.dtype)


def compress_blocks(blocks_flat, w, b):
    # blocks_flat: (M, L*D)  -> (M, Dout) f32
    M, LD = blocks_flat.shape
    Dout = w.shape[1]
    TM = 512
    if M <= TM:
        Mp = _round_up(M, 8)
        TM = Mp
    else:
        Mp = _round_up(M, TM)
    if Mp != M:
        blocks_flat = jnp.pad(blocks_flat, ((0, Mp - M), (0, 0)))

    out = pl.pallas_call(
        _compress_kernel,
        out_shape=jax.ShapeDtypeStruct((Mp, Dout), jnp.float32),
        grid=(Mp // TM,),
        in_specs=[
            pl.BlockSpec((TM, LD), lambda i: (i, 0)),
            pl.BlockSpec((LD, Dout), lambda i: (0, 0)),
            pl.BlockSpec((1, Dout), lambda i: (0, 0)),
        ],
        out_specs=pl.BlockSpec((TM, Dout), lambda i: (i, 0)),
        compiler_params=pltpu.CompilerParams(
            dimension_semantics=("parallel",),
            vmem_limit_bytes=_VMEM_LIMIT,
        ),
    )(blocks_flat, w, b)
    return out[:M]


# ----------------------------------------------------------------------------
# Kernel 2: compressed-branch attention + fused gqa-sum of selection probs.
#   grid = (B, Hkv, S//TQ, gqa) ; the trailing gqa axis is "arbitrary" so the
#   (B, Hkv, TQ, NCB) probability-sum output stays VMEM-resident across it.
# ----------------------------------------------------------------------------
def _cmp_attn_kernel(q_ref, ck_ref, cv_ref, o_ref, ps_ref, *, scale, stride, block, tq):
    qi = pl.program_id(2)
    g = pl.program_id(3)

    q = q_ref[...]            # (TQ, D)   bf16
    ck = ck_ref[...]          # (NCB, D)  bf16
    cv = cv_ref[...]          # (NCB, Dv) bf16
    ncb = ck.shape[0]

    s = jax.lax.dot_general(q, ck, (((1,), (1,)), ((), ())),
                            preferred_element_type=jnp.float32) * scale  # (TQ, NCB)
    t = qi * tq + jax.lax.broadcasted_iota(jnp.int32, (tq, ncb), 0)
    j = jax.lax.broadcasted_iota(jnp.int32, (tq, ncb), 1)
    # compressed block j covers tokens [j*stride, j*stride + block - 1]; visible if fully past.
    vis = (j * stride + block - 1) <= t
    s = jnp.where(vis, s, -1e30)
    m = jnp.max(s, axis=-1, keepdims=True)
    e = jnp.where(vis, jnp.exp(s - m), 0.0)
    d = jnp.sum(e, axis=-1, keepdims=True)
    p = e * pl.reciprocal(jnp.maximum(d, 1e-20), approx=True)   # rows w/ no visible block -> 0

    o_ref[...] = jnp.dot(p.astype(cv.dtype), cv, preferred_element_type=jnp.float32)

    @pl.when(g == 0)
    def _():
        ps_ref[...] = p

    @pl.when(g > 0)
    def _():
        ps_ref[...] = ps_ref[...] + p


def compressed_attention(q, ck, cv, *, scale, stride, block, tq, gqa):
    B, Hq, S, D = q.shape
    _, Hkv, NCB, _ = ck.shape
    Dv = cv.shape[3]
    kern = functools.partial(_cmp_attn_kernel, scale=scale, stride=stride, block=block, tq=tq)
    return pl.pallas_call(
        kern,
        out_shape=(
            jax.ShapeDtypeStruct((B, Hq, S, Dv), jnp.float32),    # compressed-branch output
            jax.ShapeDtypeStruct((B, Hkv, S, NCB), jnp.float32),  # gqa-summed selection probs
        ),
        grid=(B, Hkv, S // tq, gqa),
        in_specs=[
            pl.BlockSpec((None, None, tq, D), lambda b, hk, qi, g, G=gqa: (b, hk * G + g, qi, 0)),
            pl.BlockSpec((None, None, NCB, D), lambda b, hk, qi, g: (b, hk, 0, 0)),
            pl.BlockSpec((None, None, NCB, Dv), lambda b, hk, qi, g: (b, hk, 0, 0)),
        ],
        out_specs=[
            pl.BlockSpec((None, None, tq, Dv), lambda b, hk, qi, g, G=gqa: (b, hk * G + g, qi, 0)),
            pl.BlockSpec((None, None, tq, NCB), lambda b, hk, qi, g: (b, hk, qi, 0)),
        ],
        compiler_params=pltpu.CompilerParams(
            dimension_semantics=("parallel", "parallel", "parallel", "arbitrary"),
            vmem_limit_bytes=_VMEM_LIMIT,
        ),
    )(q, ck, cv)


# ----------------------------------------------------------------------------
# Kernel 3: selected-block attention + sliding-window attention + gated combine.
#   Query-tiled; selection comes in as top-k block indices (no dense S×S mask);
#   exp() shared between both branches; GQA via h // gqa index_maps.
# ----------------------------------------------------------------------------
def _sel_swa_kernel(q_ref, k_ref, v_ref, idx_ref, gate_ref, cmp_ref, o_ref,
                    *, scale, window, sel_blk, tq, n_sel):
    qi = pl.program_id(2)

    q = q_ref[...]            # (TQ, D)  bf16
    k = k_ref[...]            # (S, D)   bf16
    v = v_ref[...]            # (S, Dv)  bf16
    idx = idx_ref[...]        # (TQ, K)  int32  (selected block ids per query token)
    gate = gate_ref[...]      # (TQ, 3)  f32
    S = k.shape[0]

    s = jax.lax.dot_general(q, k, (((1,), (1,)), ((), ())),
                            preferred_element_type=jnp.float32) * scale  # (TQ, S)

    trow = qi * tq + jax.lax.broadcasted_iota(jnp.int32, (tq, S), 0)
    pcol = jax.lax.broadcasted_iota(jnp.int32, (tq, S), 1)
    causal = pcol <= trow
    swa_mask = causal & ((trow - pcol) < window)

    pblk = pcol // sel_blk
    sel = idx[:, 0:1] == pblk
    for kk in range(1, n_sel):
        sel = sel | (idx[:, kk:kk + 1] == pblk)
    sel_mask = causal & sel

    # shared softmax base: one exp over the causal-visible scores (both masks ⊆ causal)
    s = jnp.where(causal, s, -1e30)
    m = jnp.max(s, axis=-1, keepdims=True)
    e = jnp.exp(s - m)
    num_sel = jnp.where(sel_mask, e, 0.0)
    num_swa = jnp.where(swa_mask, e, 0.0)
    d_sel = jnp.sum(num_sel, axis=-1, keepdims=True)
    d_swa = jnp.sum(num_swa, axis=-1, keepdims=True)
    p_sel = num_sel * pl.reciprocal(jnp.maximum(d_sel, 1e-20), approx=True)
    p_swa = num_swa * pl.reciprocal(jnp.maximum(d_swa, 1e-20), approx=True)

    o_sel = jnp.dot(p_sel.astype(v.dtype), v, preferred_element_type=jnp.float32)
    o_swa = jnp.dot(p_swa.astype(v.dtype), v, preferred_element_type=jnp.float32)

    o = gate[:, 0:1] * o_sel + gate[:, 1:2] * o_swa + gate[:, 2:3] * cmp_ref[...]
    o_ref[...] = o.astype(o_ref.dtype)


def selection_sliding_attention(q, k, v, indices, gates, cmp_o, *, scale, window,
                                sel_blk, tq, gqa, out_dtype):
    B, Hq, S, D = q.shape
    Dv = v.shape[3]
    Kc = indices.shape[3]
    kern = functools.partial(_sel_swa_kernel, scale=scale, window=window,
                             sel_blk=sel_blk, tq=tq, n_sel=Kc)
    return pl.pallas_call(
        kern,
        out_shape=jax.ShapeDtypeStruct((B, Hq, S, Dv), out_dtype),
        grid=(B, Hq, S // tq),
        in_specs=[
            pl.BlockSpec((None, None, tq, D), lambda b, h, qi: (b, h, qi, 0)),
            pl.BlockSpec((None, None, S, D), lambda b, h, qi, G=gqa: (b, h // G, 0, 0)),
            pl.BlockSpec((None, None, S, Dv), lambda b, h, qi, G=gqa: (b, h // G, 0, 0)),
            pl.BlockSpec((None, None, tq, Kc), lambda b, h, qi, G=gqa: (b, h // G, qi, 0)),
            pl.BlockSpec((None, None, tq, 3), lambda b, h, qi: (b, h, qi, 0)),
            pl.BlockSpec((None, None, tq, Dv), lambda b, h, qi: (b, h, qi, 0)),
        ],
        out_specs=pl.BlockSpec((None, None, tq, Dv), lambda b, h, qi: (b, h, qi, 0)),
        compiler_params=pltpu.CompilerParams(
            dimension_semantics=("parallel", "parallel", "parallel"),
            vmem_limit_bytes=_VMEM_LIMIT,
        ),
    )(q, k, v, indices, gates, cmp_o)


# ----------------------------------------------------------------------------
# JAX glue: NSAAttention module
# ----------------------------------------------------------------------------
class NSAAttentionPallas:
    def __init__(self, head_dim, causal=False, softmax_scale=None, attention_dropout=0.0,
                 deterministic=False, compression_stride=16, compression_block=32,
                 selection_block=64, selected_block_count=16, sliding_window=512, seed=0):
        assert attention_dropout == 0.0  # dropout not used in inference path
        self.causal = causal
        self.softmax_scale = softmax_scale
        self.sliding_window = sliding_window
        self.selected_block_count = selected_block_count
        self.selection_block_size = selection_block
        self.compression_stride = compression_stride
        self.compression_block = compression_block
        self.head_dim = head_dim
        self.pool_kernel_size = selection_block // compression_stride + 1
        self.pool_padding = max(0, compression_block // compression_stride - 2)
        self.pool_stride = selection_block // compression_stride

        # Deterministic parameter init (KVCompressor projections + intra-block pos-emb + gating).
        D, L = head_dim, compression_block
        ks = jax.random.split(jax.random.PRNGKey(seed), 5)
        init = lambda kk, shp: 0.02 * jax.random.normal(kk, shp, jnp.float32)
        self.pe_k = init(ks[0], (L, D))
        self.pe_v = init(ks[1], (L, D))
        self.w_ck = init(ks[2], (L * D, D))
        self.b_ck = jnp.zeros((1, D), jnp.float32)
        self.w_cv = init(ks[3], (L * D, D))
        self.b_cv = jnp.zeros((1, D), jnp.float32)
        self.w_g = init(ks[4], (D, 3))
        self.b_g = jnp.zeros((3,), jnp.float32)

    def __call__(self, q, k, v, cu_seqlens, max_seqlen, causal=None):
        causal = self.causal if causal is None else causal
        if not causal:
            # TODO(synk): non-causal path of upstream attn_func/selection_attention not reproduced.
            raise NotImplementedError("only the causal NSA path is implemented")

        bs = cu_seqlens.shape[0] - 1
        total, Hq, D = q.shape
        _, Hkv, Dv = v.shape
        assert total % bs == 0, "equal-length sequences assumed"
        S = total // bs
        gqa = Hq // Hkv
        scale = self.softmax_scale if self.softmax_scale is not None else 1.0 / math.sqrt(D)

        L = self.compression_block
        stride = self.compression_stride
        sel_blk = self.selection_block_size
        NCB = (S - L) // stride + 1
        NSB = S // sel_blk
        TQ = _pick_q_tile(S)
        out_dtype = q.dtype
        bf16 = jnp.bfloat16

        # (total, H, D) -> (B, H, S, D)
        q_bh = q.reshape(bs, S, Hq, D).transpose(0, 2, 1, 3)
        k_bh = k.reshape(bs, S, Hkv, D).transpose(0, 2, 1, 3)
        v_bh = v.reshape(bs, S, Hkv, Dv).transpose(0, 2, 1, 3)

        # ---- gating linear, hoisted to a single XLA matmul over all heads ----
        # TODO(synk): upstream may sigmoid the gate scores; the visible addcmul uses the raw
        #             g2, so raw linear outputs are used for all three gates (as before).
        gates = jnp.einsum("bhsd,de->bhse", q_bh.astype(jnp.float32), self.w_g) + self.b_g

        # ---- KVCompressor: gather overlapping blocks (glue), one fat bf16 matmul (Pallas) ----
        # TODO(synk): gathering the overlapping windows in-kernel (strided DMA) would avoid the
        #             L/stride-fold duplicated kb/vb arrays in HBM.
        idx = jnp.arange(NCB)[:, None] * stride + jnp.arange(L)[None, :]          # (NCB, L)
        kb = (k_bh[:, :, idx, :] + self.pe_k[None, None, None]).astype(bf16)      # (B,Hkv,NCB,L,D)
        vb = (v_bh[:, :, idx, :] + self.pe_v[None, None, None]).astype(bf16)
        kb_flat = kb.reshape(bs * Hkv * NCB, L * D)
        vb_flat = vb.reshape(bs * Hkv * NCB, L * Dv)
        ck = compress_blocks(kb_flat, self.w_ck.astype(bf16), self.b_ck).reshape(bs, Hkv, NCB, D)
        cv = compress_blocks(vb_flat, self.w_cv.astype(bf16), self.b_cv).reshape(bs, Hkv, NCB, Dv)

        # ---- compressed attention + fused per-kv-head selection scores (Pallas) ----
        cmp_o, scores = compressed_attention(
            q_bh.astype(bf16), ck.astype(bf16), cv.astype(bf16),
            scale=scale, stride=stride, block=L, tq=TQ, gqa=gqa)   # scores: (B,Hkv,S,NCB)

        # ---- block-importance pooling -> top-k selected block indices (glue) ----
        pp = self.pool_padding
        sp = jnp.pad(scores, ((0, 0), (0, 0), (0, 0), (pp, pp)))
        needed = (NSB - 1) * self.pool_stride + self.pool_kernel_size
        if needed > sp.shape[-1]:
            sp = jnp.pad(sp, ((0, 0), (0, 0), (0, 0), (0, needed - sp.shape[-1])))
        pooled = jax.lax.reduce_window(
            sp, -jnp.inf, jax.lax.max,
            (1, 1, 1, self.pool_kernel_size), (1, 1, 1, self.pool_stride), "VALID")[..., :NSB]

        t_idx = jnp.arange(S)
        blk_idx = jnp.arange(NSB)
        allowed = (blk_idx[None, :] * sel_blk) <= t_idx[:, None]                  # (S, NSB)
        pooled = jnp.where(allowed[None, None], pooled, -jnp.inf)
        force = (blk_idx[None, :] == (t_idx // sel_blk)[:, None]) | (blk_idx[None, :] == 0)
        pooled = jnp.where(force[None, None], 1e9, pooled)     # always keep block 0 + current
        Kc = min(self.selected_block_count, NSB)
        _, indices = jax.lax.top_k(pooled, Kc)                                    # (B,Hkv,S,Kc)
        indices = indices.astype(jnp.int32)

        # ---- selected-block + sliding-window attention + gated combine (Pallas) ----
        o = selection_sliding_attention(
            q_bh.astype(bf16), k_bh.astype(bf16), v_bh.astype(bf16),
            indices, gates.astype(jnp.float32), cmp_o,
            scale=scale, window=self.sliding_window, sel_blk=sel_blk,
            tq=TQ, gqa=gqa, out_dtype=out_dtype)

        # (B, Hq, S, Dv) -> (total, Hq, Dv)
        return o.transpose(0, 2, 1, 3).reshape(bs * S, Hq, Dv)


if __name__ == "__main__":
    B, S, Hq, Hkv, D = 2, 64, 4, 2, 32   # gqa = 2 exercises the h//gqa index maps
    module = NSAAttentionPallas(
        head_dim=D, causal=True, softmax_scale=None,
        compression_stride=8, compression_block=16,
        selection_block=16, selected_block_count=2,
        sliding_window=16, seed=0,
    )

    key = jax.random.PRNGKey(0)
    kq, kk, kv = jax.random.split(key, 3)
    q = jax.random.normal(kq, (B * S, Hq, D), jnp.float32)
    k = jax.random.normal(kk, (B * S, Hkv, D), jnp.float32)
    v = jax.random.normal(kv, (B * S, Hkv, D), jnp.float32)
    cu_seqlens = jnp.arange(B + 1, dtype=jnp.int32) * S

    out = module(q, k, v, cu_seqlens, S)
    out = jax.block_until_ready(out)
    assert out.shape == (B * S, Hq, D), out.shape
    assert bool(jnp.all(jnp.isfinite(out)))
    print("KERNEL_OK")
</pallas_src>

<mosaic_0001>
module attributes {stable_mosaic.version = 11 : i64} {
  func.func @_compress_kernel(%arg0: i32, %arg1: memref<32x512xbf16, #tpu.memory_space<vmem>>, %arg2: memref<512x32xbf16, #tpu.memory_space<vmem>>, %arg3: memref<1x32xf32, #tpu.memory_space<vmem>>, %arg4: memref<32x32xf32, #tpu.memory_space<vmem>>) attributes {dimension_semantics = [#tpu.dimension_semantics<parallel>], iteration_bounds = array<i64: 1>, scalar_prefetch = 0 : i64, scratch_operands = 0 : i64, tpu.core_type = #tpu.core_type<tc>, window_params = [{transform_indices = @transform_0, window_bounds = array<i64: 32, 512>}, {pipeline_mode = #tpu.pipeline_mode<synchronous>, transform_indices = @transform_1, window_bounds = array<i64: 512, 32>}, {pipeline_mode = #tpu.pipeline_mode<synchronous>, transform_indices = @transform_2, window_bounds = array<i64: 1, 32>}, {transform_indices = @transform_3, window_bounds = array<i64: 32, 32>}]} {
    %c0 = arith.constant 0 : index
    %c0_0 = arith.constant 0 : index
    %0 = vector.load %arg1[%c0, %c0_0] : memref<32x512xbf16, #tpu.memory_space<vmem>>, vector<32x512xbf16>
    %c0_1 = arith.constant 0 : index
    %c0_2 = arith.constant 0 : index
    %1 = vector.load %arg2[%c0_1, %c0_2] : memref<512x32xbf16, #tpu.memory_space<vmem>>, vector<512x32xbf16>
    %cst = arith.constant dense<0.000000e+00> : vector<32x32xf32>
    %2 = tpu.matmul %0, %1, %cst {dimension_numbers = #tpu.dot_dimension_numbers<[1], [0], [0], [1], [0, 0, 1, 1], [], []>} : vector<32x512xbf16>, vector<512x32xbf16>, vector<32x32xf32> -> vector<32x32xf32>
    %c0_3 = arith.constant 0 : index
    %c0_4 = arith.constant 0 : index
    %3 = vector.load %arg3[%c0_3, %c0_4] : memref<1x32xf32, #tpu.memory_space<vmem>>, vector<1x32xf32>
    %4 = vector.broadcast %3 : vector<1x32xf32> to vector<32x32xf32>
    %5 = arith.addf %2, %4 : vector<32x32xf32>
    %c0_5 = arith.constant 0 : index
    %c0_6 = arith.constant 0 : index
    %6 = vector.load %arg4[%c0_5, %c0_6] : memref<32x32xf32, #tpu.memory_space<vmem>>, vector<32x32xf32>
    tpu.vector_store %arg4[%c0_5, %c0_6], %5 {strides = array<i32>} : memref<32x32xf32, #tpu.memory_space<vmem>>, vector<32x32xf32>,
    return
  }
  func.func @transform_0(%arg0: i32) -> (i32, i32) {
    %c0_i32 = arith.constant 0 : i32
    %c0_i32_0 = arith.constant 0 : i32
    return %arg0, %c0_i32 : i32, i32
  }
  func.func @transform_1(%arg0: i32) -> (i32, i32) {
    %c0_i32 = arith.constant 0 : i32
    %c0_i32_0 = arith.constant 0 : i32
    %c0_i32_1 = arith.constant 0 : i32
    return %c0_i32, %c0_i32_0 : i32, i32
  }
  func.func @transform_2(%arg0: i32) -> (i32, i32) {
    %c0_i32 = arith.constant 0 : i32
    %c0_i32_0 = arith.constant 0 : i32
    %c0_i32_1 = arith.constant 0 : i32
    return %c0_i32, %c0_i32_0 : i32, i32
  }
  func.func @transform_3(%arg0: i32) -> (i32, i32) {
    %c0_i32 = arith.constant 0 : i32
    %c0_i32_0 = arith.constant 0 : i32
    return %arg0, %c0_i32 : i32, i32
  }
}

</mosaic_0001>

<bundles_post_ra>
// kernel: tpu_custom_call.1
= control target key start
LH: loop header
LB: loop body
LE: loop exit
PB: predicated region body
PF: predicated region fallthrough
CT: control target
= control target key end

     0   :  { %s776_s0 = inlined_call_operand.vmem [shape: bf16[32,512], index: 0, kind: input, shape index: {}]   ;;  %s777_s1 = inlined_call_operand.vmem [shape: bf16[512,32], index: 1, kind: input, shape index: {}]   ;;  %s778_s2 = inlined_call_operand.vmem [shape: f32[1,32], index: 2, kind: input, shape index: {}]   ;;  %s779_s3 = inlined_call_operand.hbm [shape: f32[32,32], index: 3, kind: output, shape index: {}]  }
   0x1   :  { %v546_v0 = vld [vmem:[%s777_s1 + $0x40] sm:$0xff]   ;;  %v550_v4 = vld [vmem:[%s777_s1 + $0x48] sm:$0xff]   ;;  %v554_v8 = vld [vmem:[%s777_s1 + $0x50] sm:$0xff]  }
   0x2   :  { %v547_v1 = vld [vmem:[%s777_s1 + $0xc0] sm:$0xff]   ;;  %487 = vmatprep.subr.bf16.mxu0 %v546_v0  ;;  %v551_v5 = vld [vmem:[%s777_s1 + $0xc8] sm:$0xff]   ;;  %v555_v9 = vld [vmem:[%s777_s1 + $0xd0] sm:$0xff]  }
   0x3   :  { %v548_v2 = vld [vmem:[%s777_s1] sm:$0xff]   ;;  %515 = vmatprep.subr.bf16.mxu1 %v547_v1  ;;  %v552_v6 = vld [vmem:[%s777_s1 + $0x8] sm:$0xff]   ;;  %v556_v10 = vld [vmem:[%s777_s1 + $0x10] sm:$0xff]  }
   0x4   :  { %v549_v3 = vld [vmem:[%s777_s1 + $0x80] sm:$0xff]   ;;  %488 = vmatpush3.bf16.msra.mxu0 %v548_v2  ;;  %v553_v7 = vld [vmem:[%s777_s1 + $0x88] sm:$0xff]   ;;  %v557_v11 = vld [vmem:[%s777_s1 + $0x90] sm:$0xff]  }
   0x5   :  { %516 = vmatpush3.bf16.msra.mxu1 %v549_v3  ;;  %489 = vmatprep.subr.bf16.mxu0 %v550_v4  ;;  %v558_v12 = vld [vmem:[%s777_s1 + $0x58] sm:$0xff]   ;;  %v562_v16 = vld [vmem:[%s777_s1 + $0x60] sm:$0xff]   ;;  %v566_v20 = vld [vmem:[%s777_s1 + $0x68] sm:$0xff]  }
   0x6   :  { %517 = vmatprep.subr.bf16.mxu1 %v551_v5  ;;  %v559_v13 = vld [vmem:[%s777_s1 + $0xd8] sm:$0xff]   ;;  %v563_v17 = vld [vmem:[%s777_s1 + $0xe0] sm:$0xff]   ;;  %v567_v21 = vld [vmem:[%s777_s1 + $0xe8] sm:$0xff]  }
   0x7   :  { %v560_v14 = vld [vmem:[%s777_s1 + $0x18] sm:$0xff]   ;;  %v564_v18 = vld [vmem:[%s777_s1 + $0x20] sm:$0xff]   ;;  %v568_v22 = vld [vmem:[%s777_s1 + $0x28] sm:$0xff]  }
   0x8   :  { %490 = vmatpush3.bf16.msra.mxu0 %v552_v6  ;;  %v561_v15 = vld [vmem:[%s777_s1 + $0x98] sm:$0xff]   ;;  %v565_v19 = vld [vmem:[%s777_s1 + $0xa0] sm:$0xff]   ;;  %v569_v23 = vld [vmem:[%s777_s1 + $0xa8] sm:$0xff]  }
   0x9   :  { %518 = vmatpush3.bf16.msra.mxu1 %v553_v7  ;;  %491 = vmatprep.subr.bf16.mxu0 %v554_v8  ;;  %v570_v24 = vld [vmem:[%s777_s1 + $0x70] sm:$0xff]   ;;  %v574_v28 = vld [vmem:[%s777_s1 + $0x78] sm:$0xff]  }
   0xa   :  { %519 = vmatprep.subr.bf16.mxu1 %v555_v9  ;;  %v571_v25 = vld [vmem:[%s777_s1 + $0xf0] sm:$0xff]   ;;  %v575_v29 = vld [vmem:[%s777_s1 + $0xf8] sm:$0xff]  }
   0xb   :  { %v572_v26 = vld [vmem:[%s777_s1 + $0x30] sm:$0xff]   ;;  %v576_v30 = vld [vmem:[%s777_s1 + $0x38] sm:$0xff]  }
   0xc   :  { %492 = vmatpush3.bf16.msra.mxu0 %v556_v10  ;;  %v573_v27 = vld [vmem:[%s777_s1 + $0xb0] sm:$0xff]   ;;  %v577_v31 = vld [vmem:[%s777_s1 + $0xb8] sm:$0xff]  }
   0xd   :  { %520 = vmatpush3.bf16.msra.mxu1 %v557_v11  ;;  %493 = vmatprep.subr.bf16.mxu0 %v558_v12  ;;  %v578_v32 = vld [vmem:[%s776_s0] ss:$16 sps:$4 sm:$0xff]   ;;  %v580_v33 = vld [vmem:[%s776_s0 + $0x4] ss:$16 sps:$4 sm:$0xff]   ;;  %v581_v34 = vld [vmem:[%s776_s0 + $0x8] ss:$16 sps:$4 sm:$0xff]  }
   0xe   :  { %521 = vmatprep.subr.bf16.mxu1 %v559_v13  ;;  %v583_v35 = vld [vmem:[%s776_s0 + $0xc] ss:$16 sps:$4 sm:$0xff]   ;;  %359 = vmatprep.mubr.bf16.mxu0 %v580_v33  ;;  %v584_v36 = vld [vmem:[%s776_s0 + $0x24] ss:$16 sps:$4 sm:$0xff]  }
   0xf   :  { %408 = vmatprep.mubr.bf16.mxu1 %v583_v35  ;;  %v586_v37 = vld [vmem:[%s776_s0 + $0x2c] ss:$16 sps:$4 sm:$0xff]  }
  0x10   :  { %494 = vmatpush3.bf16.msra.mxu0 %v560_v14 }
  0x11   :  { %522 = vmatpush3.bf16.msra.mxu1 %v561_v15  ;;  %495 = vmatprep.subr.bf16.mxu0 %v562_v16 }
  0x12   :  { %523 = vmatprep.subr.bf16.mxu1 %v563_v17 }
  0x14   :  { %496 = vmatpush3.bf16.msra.mxu0 %v564_v18 }
  0x15   :  { %524 = vmatpush3.bf16.msra.mxu1 %v565_v19  ;;  %497 = vmatprep.subr.bf16.mxu0 %v566_v20 }
  0x16   :  { %525 = vmatprep.subr.bf16.mxu1 %v567_v21 }
  0x18   :  { %498 = vmatpush3.bf16.msra.mxu0 %v568_v22 }
  0x19   :  { %526 = vmatpush3.bf16.msra.mxu1 %v569_v23  ;;  %499 = vmatprep.subr.bf16.mxu0 %v570_v24 }
  0x1a   :  { %527 = vmatprep.subr.bf16.mxu1 %v571_v25 }
  0x1c   :  { %500 = vmatpush3.bf16.msra.mxu0 %v572_v26 }
  0x1d   :  { %528 = vmatpush3.bf16.msra.mxu1 %v573_v27  ;;  %501 = vmatprep.subr.bf16.mxu0 %v574_v28 }
  0x1e   :  { %529 = vmatprep.subr.bf16.mxu1 %v575_v29 }
  0x20   :  { %502 = vmatpush3.bf16.msra.mxu0 %v576_v30 }
  0x21   :  { %530 = vmatpush3.bf16.msra.mxu1 %v577_v31 }
  0x23   :  { %360 = vmatmul.mubr.bf16.vlgmr.msra.gmra.mrb[0].mxu0 %v578_v32 }
  0x24   :  { %409 = vmatmul.mubr.bf16.vlgmr.msra.gmra.mrb[0].mxu1 %v581_v34  ;;  %367 = vmatprep.mubr.bf16.mxu0 %v584_v36 }
  0x25   :  { %8 = vsyncpa [#allocation3], 0  ;;  %416 = vmatprep.mubr.bf16.mxu1 %v586_v37  ;;  %v588_v38 = vld [vmem:[%s776_s0 + $0x20] ss:$16 sps:$4 sm:$0xff]   ;;  %v589_v39 = vld [vmem:[%s776_s0 + $0x28] ss:$16 sps:$4 sm:$0xff]  }
  0x26   :  { %v446_v42 = vld [vmem:[%s778_s2] ss:$0 sm:$0xff]  ;;  %vm425_vm0 = vcmask 261120   ;;  %s614_s0 = smov [#allocation2]  }
  0x27   :  { %s435_s2 = sshll.u32 %s614_s0, 4  ;;  %s436_s2 = int_to_ptr.vmem [resolvable:$true] %s435_s2 }
  0x28   :  { %s590_s12 = scalar_lea.vmem %s436_s2, 512  ;;  %p595_p1 = scmp.lt.s32.totalorder %s436_s2, %s436_s2 }
  0x29   :  { %p591_p0 = scmp.ne.s32.totalorder %s436_s2, %s590_s12  ;;  %p596_p2 = scmp.lt.s32.totalorder %s590_s12, %s590_s12 }
  0x2b   :  { %368 = vmatmul.mubr.bf16.gmra.mrb[4].mxu0 %v588_v38  ;;  %p597_p3 = por %p596_p2, %p595_p1 }
  0x2c   :  { %417 = vmatmul.mubr.bf16.gmra.mrb[4].mxu1 %v589_v39 }
  0x2d   :  { %p598_p4 = pnand %p597_p3, %p591_p0 }
  0xf6   :  { %v503_v40 = vpop.f32.mrb[0].mxu0 }
  0xf7   :  { %v531_v41 = vpop.f32.mrb[0].mxu1  ;;  %v504_v43 = vpop.f32.mrb[1].mxu0 }
  0xf8   :  { %v505_v44 = vadd.f32 %v504_v43, %v503_v40  ;;  %v532_v45 = vpop.f32.mrb[1].mxu1  ;;  %v506_v46 = vpop.f32.mrb[2].mxu0 }
  0xf9   :  { %v533_v47 = vadd.f32 %v532_v45, %v531_v41  ;;  %v534_v48 = vpop.f32.mrb[2].mxu1  ;;  %v507_v49 = vpop.f32.mrb[3].mxu0 }
  0xfa   :  { %v362_v50 = vadd.f32 %v505_v44, %v446_v42  ;;  %v508_v51 = vadd.f32 %v507_v49, %v506_v46  ;;  %v535_v52 = vpop.f32.mrb[3].mxu1 }
  0xfb   :  { %v536_v53 = vadd.f32 %v535_v52, %v534_v48 }
  0xfc   :  { %v411_v54 = vadd.f32 %v533_v47, %v362_v50  ;;  %v365_v55 = vadd.f32 %v508_v51, %v446_v42 }
  0xfe   :  { %426 = vst.msk [vmem:[#allocation2] sm:$0xff] %vm425_vm0, %v411_v54  ;;  %v414_v56 = vadd.f32 %v536_v53, %v365_v55  ;;  %v509_v57 = vpop.f32.mrb[4].mxu0 }
  0xff   :  { %v537_v58 = vpop.f32.mrb[4].mxu1  ;;  %v510_v59 = vpop.f32.mrb[5].mxu0 }
 0x100   :  { %427 = vst.msk [vmem:[#allocation2 + $0x8] sm:$0xff] %vm425_vm0, %v414_v56  ;;  %v511_v60 = vadd.f32 %v510_v59, %v509_v57  ;;  %v538_v61 = vpop.f32.mrb[5].mxu1  ;;  %v512_v62 = vpop.f32.mrb[6].mxu0 }
 0x101   :  { %v539_v63 = vadd.f32 %v538_v61, %v537_v58  ;;  %v540_v0 = vpop.f32.mrb[6].mxu1  ;;  %v513_v1 = vpop.f32.mrb[7].mxu0 }
 0x102   :  { %v370_v2 = vadd.f32 %v511_v60, %v446_v42  ;;  %v514_v3 = vadd.f32 %v513_v1, %v512_v62  ;;  %v541_v4 = vpop.f32.mrb[7].mxu1 }
 0x103   :  { %v542_v5 = vadd.f32 %v541_v4, %v540_v0 }
 0x104   :  { %v419_v6 = vadd.f32 %v539_v63, %v370_v2  ;;  %v373_v7 = vadd.f32 %v514_v3, %v446_v42 }
 0x106   :  { %428 = vst.msk [vmem:[#allocation2 + $0x10] sm:$0xff] %vm425_vm0, %v419_v6  ;;  %v422_v8 = vadd.f32 %v542_v5, %v373_v7 }
 0x108   :  { %429 = vst.msk [vmem:[#allocation2 + $0x18] sm:$0xff] %vm425_vm0, %v422_v8 }
 0x109   :  { %601 = shalt.err (!%p598_p4)
}
 0x10a   :  { %s602_s15 = scalar_lea.hbm %s779_s3, 512 }
 0x10b   :  { %p603_p5 = scmp.ne.s32.totalorder %s779_s3, %s602_s15  ;;  %p606_p6 = scmp.lt.u32.totalorder %s602_s15, %s779_s3 }
 0x10d   :  { %p608_p7 = pnand %p606_p6, %p603_p5 }
 0x10f   :  { %611 = shalt.err (!%p608_p7)
}
 0x110   :  { %s615_s20 = smov 128   ;;  %s616_s21 = smov 8  }
 0x111   :  { %441 = dma.vmem_to_hbm [thread:$0]  %s436_s2, 512, %s779_s3, [#allocation3], %s615_s20, %s615_s20, %s616_s21  }
 0x112   :  { %612 = dma.done.wait [#allocation3], 512  }
 0x113   :  { %613 = vsyncadd [#allocation3], 4294966784 }
 0x114   :  { %445 = vsyncpa [#allocation3], 1 }

</bundles_post_ra>
